<compile_context>
chip_gen: v7x
topology: tpu7x:2x2x1
jax: 0.10.0
libtpu: 0.0.40
codegen_flags: <defaults>
</compile_context>

<pallas_src>
import functools
import math

import jax
import jax.numpy as jnp
from jax.experimental import pallas as pl
from jax.experimental.pallas import tpu as pltpu


def _spatial_exchange_kernel(x1_ref, x2_ref, o1_ref, o2_ref, *, w, p_int):
    x1 = x1_ref[...]
    x2 = x2_ref[...]
    lanes = x1.shape[-1]

    # Column index along the lane axis, built on a single (1, L) row.
    col = jax.lax.broadcasted_iota(jnp.int32, (1, lanes), 1)

    # Recover the original width index from the folded (lane-dense) column.
    if (w & (w - 1)) == 0:          # power-of-two fast path (trace-time branch)
        wi = col & (w - 1)
    else:
        wi = col % w

    if (p_int & (p_int - 1)) == 0:  # power-of-two fast path (trace-time branch)
        exch = (wi & (p_int - 1)) == 0
    else:
        exch = (wi % p_int) == 0

    # Pure per-lane select on the VPU; (1, L) mask broadcasts over rows.
    o1_ref[...] = jnp.where(exch, x2, x1)
    o2_ref[...] = jnp.where(exch, x1, x2)


_LANE_CAP = 4096       # max folded lane width (large multiple of 128 preferred)
_TILE_BYTES = 1 << 20  # ~1 MiB per tensor tile -> ~8 MiB live with 2x buffering


def _choose_layout(shape, dtype):
    """Pick a lane-dense 2-D layout (rows, lane) and a row-tile size."""
    w = shape[-1]
    m = math.prod(shape[:-1])
    itemsize = jnp.dtype(dtype).itemsize

    # Fold factor k (divisor of m): lane width L = k*w.  Prefer L % 128 == 0,
    # then the largest L <= _LANE_CAP.  k=1 (no fold) is always a valid
    # fallback (the block then spans the full last dim).
    best_k = 1
    best_key = (w % 128 == 0, w)
    k = 1
    while True:
        k += 1
        lane = k * w
        if lane > _LANE_CAP:
            break
        if m % k:
            continue
        key = (lane % 128 == 0, lane)
        if key > best_key:
            best_key, best_k = key, k

    lane = best_k * w
    rows = m // best_k

    # Row-tile: multiple of the sublane packing for this dtype (8 f32 / 16 bf16
    # / 32 int8), sized to ~_TILE_BYTES per tensor.
    sub = 8 * max(1, 4 // itemsize)
    tile_r = max(sub, (_TILE_BYTES // (lane * itemsize)) // sub * sub)
    tile_r = min(tile_r, rows)
    return rows, lane, tile_r


def spatial_exchange(x1: jax.Array, x2: jax.Array, p: float = 0.5, *,
                     donate_inputs: bool = False):
    """Pallas implementation of SpatialExchange.forward.

    x1, x2: NCHW tensors of identical shape/dtype.
    Returns (out_x1, out_x2).
    """
    assert x1.shape == x2.shape and x1.dtype == x2.dtype
    assert 0 < p <= 1
    p_int = int(1 / p)

    shape, dtype = x1.shape, x1.dtype
    w = shape[-1]

    rows, lane, tile_r = _choose_layout(shape, dtype)

    # Lane-dense reshape (pure layout plumbing outside the kernel).  Since
    # lane % w == 0, each slab row is whole width-W segments, so col % w
    # recovers the true width index for the exchange mask.
    x1f = x1.reshape(rows, lane)
    x2f = x2.reshape(rows, lane)

    kernel = functools.partial(_spatial_exchange_kernel, w=w, p_int=p_int)
    spec = pl.BlockSpec((tile_r, lane), lambda i: (i, 0))
    grid = (pl.cdiv(rows, tile_r),)

    out_shape = (
        jax.ShapeDtypeStruct((rows, lane), dtype),
        jax.ShapeDtypeStruct((rows, lane), dtype),
    )
    io_aliases = {0: 0, 1: 1} if donate_inputs else {}

    o1f, o2f = pl.pallas_call(
        kernel,
        grid=grid,
        in_specs=[spec, spec],
        out_specs=(spec, spec),
        out_shape=out_shape,
        input_output_aliases=io_aliases,
        compiler_params=pltpu.CompilerParams(
            dimension_semantics=("parallel",)),
    )(x1f, x2f)

    return o1f.reshape(shape), o2f.reshape(shape)


def _reference(x1, x2, p=0.5):
    p_int = int(1 / p)
    w = x1.shape[-1]
    exch = (jnp.arange(w) % p_int) == 0
    out1 = jnp.where(exch[None, None, None, :], x2, x1)
    out2 = jnp.where(exch[None, None, None, :], x1, x2)
    return out1, out2


if __name__ == "__main__":
    key = jax.random.PRNGKey(0)
    k1, k2 = jax.random.split(key)
    # Small NCHW feature maps: batch=2, C=4, H=16, W=16
    x1 = jax.random.normal(k1, (2, 4, 16, 16), dtype=jnp.float32)
    x2 = jax.random.normal(k2, (2, 4, 16, 16), dtype=jnp.float32)

    out1, out2 = spatial_exchange(x1, x2, p=0.5)
    jax.block_until_ready((out1, out2))

    ref1, ref2 = _reference(x1, x2, p=0.5)
    assert jnp.array_equal(out1, ref1)
    assert jnp.array_equal(out2, ref2)
    print("KERNEL_OK")
</pallas_src>

<mosaic_0001>
module attributes {stable_mosaic.version = 11 : i64} {
  func.func @_spatial_exchange_kernel(%arg0: i32, %arg1: memref<1x2048xf32, #tpu.memory_space<vmem>>, %arg2: memref<1x2048xf32, #tpu.memory_space<vmem>>, %arg3: memref<1x2048xf32, #tpu.memory_space<vmem>>, %arg4: memref<1x2048xf32, #tpu.memory_space<vmem>>) attributes {dimension_semantics = [#tpu.dimension_semantics<parallel>], iteration_bounds = array<i64: 1>, scalar_prefetch = 0 : i64, scratch_operands = 0 : i64, tpu.core_type = #tpu.core_type<tc>, window_params = [{transform_indices = @transform_0, window_bounds = array<i64: 1, 2048>}, {transform_indices = @transform_1, window_bounds = array<i64: 1, 2048>}, {transform_indices = @transform_2, window_bounds = array<i64: 1, 2048>}, {transform_indices = @transform_3, window_bounds = array<i64: 1, 2048>}]} {
    %c0 = arith.constant 0 : index
    %c0_0 = arith.constant 0 : index
    %0 = vector.load %arg1[%c0, %c0_0] : memref<1x2048xf32, #tpu.memory_space<vmem>>, vector<1x2048xf32>
    %c0_1 = arith.constant 0 : index
    %c0_2 = arith.constant 0 : index
    %1 = vector.load %arg2[%c0_1, %c0_2] : memref<1x2048xf32, #tpu.memory_space<vmem>>, vector<1x2048xf32>
    %2 = tpu.iota {dimensions = array<i32: 1>} : vector<1x2048xi32>
    %c15_i32 = arith.constant 15 : i32
    %3 = vector.broadcast %c15_i32 : i32 to vector<1x2048xi32>
    %4 = arith.andi %2, %3 : vector<1x2048xi32>
    %c1_i32 = arith.constant 1 : i32
    %5 = vector.broadcast %c1_i32 : i32 to vector<1x2048xi32>
    %6 = arith.andi %4, %5 : vector<1x2048xi32>
    %c0_i32 = arith.constant 0 : i32
    %7 = vector.broadcast %c0_i32 : i32 to vector<1x2048xi32>
    %8 = arith.cmpi eq, %6, %7 : vector<1x2048xi32>
    %9 = arith.select %8, %1, %0 : vector<1x2048xi1>, vector<1x2048xf32>
    %c0_3 = arith.constant 0 : index
    %c0_4 = arith.constant 0 : index
    %10 = vector.load %arg3[%c0_3, %c0_4] : memref<1x2048xf32, #tpu.memory_space<vmem>>, vector<1x2048xf32>
    tpu.vector_store %arg3[%c0_3, %c0_4], %9 {strides = array<i32>} : memref<1x2048xf32, #tpu.memory_space<vmem>>, vector<1x2048xf32>,
    %11 = arith.select %8, %0, %1 : vector<1x2048xi1>, vector<1x2048xf32>
    %c0_5 = arith.constant 0 : index
    %c0_6 = arith.constant 0 : index
    %12 = vector.load %arg4[%c0_5, %c0_6] : memref<1x2048xf32, #tpu.memory_space<vmem>>, vector<1x2048xf32>
    tpu.vector_store %arg4[%c0_5, %c0_6], %11 {strides = array<i32>} : memref<1x2048xf32, #tpu.memory_space<vmem>>, vector<1x2048xf32>,
    return
  }
  func.func @transform_0(%arg0: i32) -> (i32, i32) {
    %c0_i32 = arith.constant 0 : i32
    %c0_i32_0 = arith.constant 0 : i32
    return %arg0, %c0_i32 : i32, i32
  }
  func.func @transform_1(%arg0: i32) -> (i32, i32) {
    %c0_i32 = arith.constant 0 : i32
    %c0_i32_0 = arith.constant 0 : i32
    return %arg0, %c0_i32 : i32, i32
  }
  func.func @transform_2(%arg0: i32) -> (i32, i32) {
    %c0_i32 = arith.constant 0 : i32
    %c0_i32_0 = arith.constant 0 : i32
    return %arg0, %c0_i32 : i32, i32
  }
  func.func @transform_3(%arg0: i32) -> (i32, i32) {
    %c0_i32 = arith.constant 0 : i32
    %c0_i32_0 = arith.constant 0 : i32
    return %arg0, %c0_i32 : i32, i32
  }
}

</mosaic_0001>

<bundles_post_ra>
// kernel: tpu_custom_call.1
= control target key start
LH: loop header
LB: loop body
LE: loop exit
PB: predicated region body
PF: predicated region fallthrough
CT: control target
= control target key end

     0   :  { %9 = vsyncpa [#allocation3], 0  ;;  %s1028_s0 = inlined_call_operand.hbm [shape: f32[1,2048], index: 0, kind: input, shape index: {}]   ;;  %s1029_s1 = inlined_call_operand.hbm [shape: f32[1,2048], index: 1, kind: input, shape index: {}]   ;;  %s1030_s2 = inlined_call_operand.hbm [shape: f32[1,2048], index: 2, kind: output, shape index: {0}]   ;;  %s1031_s3 = inlined_call_operand.hbm [shape: f32[1,2048], index: 3, kind: output, shape index: {1}]  }
   0x1   :  { %10 = vsyncpa [#allocation6], 0 }
   0x2   :  { %11 = vsyncpa [#allocation4], 0 }
   0x3   :  { %12 = vsyncpa [#allocation9], 0  ;;  %s671_s12 = smov [#allocation2]   ;;  %s672_s14 = smov [#allocation5]  }
   0x4   :  { %s19_s13 = sshll.u32 %s671_s12, 4  ;;  %s29_s15 = sshll.u32 %s672_s14, 4  ;;  %s20_s13 = int_to_ptr.vmem [resolvable:$true] %s19_s13  ;;  %s30_s15 = int_to_ptr.vmem [resolvable:$true] %s29_s15 }
   0x5   :  { %s575_s18 = scalar_lea.hbm %s1028_s0, 256 }
   0x6   :  { %p576_p0 = scmp.ne.s32.totalorder %s1028_s0, %s575_s18  ;;  %p579_p1 = scmp.lt.u32.totalorder %s575_s18, %s1028_s0 }
   0x8   :  { %p581_p2 = pnand %p579_p1, %p576_p0 }
   0xa   :  { %584 = shalt.err (!%p581_p2)
}
   0xb   :  { %s585_s23 = scalar_lea.vmem %s20_s13, 256  ;;  %p590_p4 = scmp.lt.s32.totalorder %s20_s13, %s20_s13 }
   0xc   :  { %p586_p3 = scmp.ne.s32.totalorder %s20_s13, %s585_s23  ;;  %p591_p5 = scmp.lt.s32.totalorder %s585_s23, %s585_s23 }
   0xe   :  { %p592_p6 = por %p591_p5, %p590_p4 }
  0x10   :  { %p593_p7 = pnand %p592_p6, %p586_p3 }
  0x12   :  { %596 = shalt.err (!%p593_p7)
}
  0x13   :  { %22 = dma.hbm_to_vmem [thread:$0]  %s1028_s0, 256, %s20_s13, [#allocation3]  }
  0x14   :  { %s597_s28 = scalar_lea.hbm %s1029_s1, 256 }
  0x15   :  { %p598_p8 = scmp.ne.s32.totalorder %s1029_s1, %s597_s28  ;;  %p601_p9 = scmp.lt.u32.totalorder %s597_s28, %s1029_s1 }
  0x17   :  { %p603_p10 = pnand %p601_p9, %p598_p8 }
  0x19   :  { %606 = shalt.err (!%p603_p10)
}
  0x1a   :  { %s607_s6 = scalar_lea.vmem %s30_s15, 256  ;;  %p612_p12 = scmp.lt.s32.totalorder %s30_s15, %s30_s15 }
  0x1b   :  { %p608_p11 = scmp.ne.s32.totalorder %s30_s15, %s607_s6  ;;  %p613_p13 = scmp.lt.s32.totalorder %s607_s6, %s607_s6 }
  0x1d   :  { %p614_p0 = por %p613_p13, %p612_p12 }
  0x1f   :  { %p615_p1 = pnand %p614_p0, %p608_p11 }
  0x21   :  { %618 = shalt.err (!%p615_p1)
}
  0x22   :  { %32 = dma.hbm_to_vmem [thread:$0]  %s1029_s1, 256, %s30_s15, [#allocation6]  }
  0x23   :  { %663 = dma.done.wait [#allocation3], 256  }
  0x24   :  { %664 = vsyncadd [#allocation3], 4294967040 }
  0x25   :  { %665 = dma.done.wait [#allocation6], 256  }
  0x26   :  { %666 = vsyncadd [#allocation6], 4294967040  ;;  %v43_v0 = vlaneseq  ;;  %v673_v1 = vmov 1966171168   ;;  %v41_v29 = vld [vmem:[#allocation5] sm:$0xff]  ;;  %v39_v31 = vld [vmem:[#allocation2] sm:$0xff] }
  0x27   :  { %v720_v2 = vunpack.c.l.s4 %v673_v1  ;;  %s674_s1 = smov [#allocation7]  }
  0x28   :  { %v722_v3 = vand.u32 127, %v43_v0  ;;  %v724_v4 = vshrl.u32 %v43_v0, 7  ;;  %s546_s8 = sshll.u32 %s674_s1, 4  ;;  %s547_s8 = int_to_ptr.vmem [resolvable:$true] %s546_s8 }
  0x29   :  { %v310_v5 = vunpack.c.0.s8 %v720_v2  ;;  %s619_s9 = scalar_lea.vmem %s547_s8, 256  ;;  %p624_p3 = scmp.lt.s32.totalorder %s547_s8, %s547_s8 }
  0x2a   :  { %v45_v6 = vadd.s32 128, %v722_v3  ;;  %v46_v7 = vadd.s32 256, %v722_v3  ;;  %v47_v8 = vadd.s32 384, %v722_v3  ;;  %v48_v9 = vadd.s32 512, %v722_v3  ;;  %p620_p2 = scmp.ne.s32.totalorder %s547_s8, %s619_s9  ;;  %p625_p4 = scmp.lt.s32.totalorder %s619_s9, %s619_s9 }
  0x2b   :  { %v49_v10 = vadd.s32 640, %v722_v3  ;;  %v50_v11 = vadd.s32 768, %v722_v3  ;;  %v51_v12 = vadd.s32 896, %v722_v3  ;;  %v60_v13 = vand.u32 15, %v722_v3 }
  0x2c   :  { %v61_v14 = vand.u32 15, %v45_v6  ;;  %v62_v15 = vand.u32 15, %v46_v7  ;;  %v63_v16 = vand.u32 15, %v47_v8  ;;  %v64_v17 = vand.u32 15, %v48_v9  ;;  %p626_p5 = por %p625_p4, %p624_p3 }
  0x2d   :  { %v65_v18 = vand.u32 15, %v49_v10  ;;  %v66_v19 = vand.u32 15, %v50_v11  ;;  %v67_v20 = vand.u32 15, %v51_v12  ;;  %v735_v21 = vand.u32 1, %v60_v13 }
  0x2e   :  { %v737_v22 = vand.u32 1, %v61_v14  ;;  %v739_v23 = vand.u32 1, %v62_v15  ;;  %v741_v24 = vand.u32 1, %v63_v16  ;;  %v743_v25 = vand.u32 1, %v64_v17  ;;  %p627_p6 = pnand %p626_p5, %p620_p2 }
  0x2f   :  { %v745_v26 = vand.u32 1, %v65_v18  ;;  %v747_v27 = vand.u32 1, %v66_v19  ;;  %v749_v28 = vand.u32 1, %v67_v20  ;;  %vm92_vm0 = vcmp.eq.s32.totalorder %v735_v21, 0 }
  0x30   :  { %vm93_vm1 = vcmp.eq.s32.totalorder %v737_v22, 0  ;;  %vm94_vm2 = vcmp.eq.s32.totalorder %v739_v23, 0  ;;  %vm95_vm3 = vcmp.eq.s32.totalorder %v741_v24, 0  ;;  %vm96_vm4 = vcmp.eq.s32.totalorder %v743_v25, 0 }
  0x31   :  { %vm97_vm5 = vcmp.eq.s32.totalorder %v745_v26, 0  ;;  %vm98_vm6 = vcmp.eq.s32.totalorder %v747_v27, 0  ;;  %vm99_vm7 = vcmp.eq.s32.totalorder %v749_v28, 0  ;;  %v760_v30 = vsub.s32 0, %v724_v4 }
  0x32   :  { %v763_v32 = vsub.s32 1, %v724_v4  ;;  %v766_v33 = vsub.s32 2, %v724_v4  ;;  %v769_v34 = vsub.s32 3, %v724_v4  ;;  %v772_v35 = vsub.s32 4, %v724_v4 }
  0x33   :  { %v775_v36 = vrot.slane %v41_v29, %v760_v30  ;;  %v778_v37 = vsub.s32 5, %v724_v4  ;;  %v781_v38 = vsub.s32 6, %v724_v4  ;;  %v784_v39 = vsub.s32 7, %v724_v4 }
  0x34   :  { %v787_v40 = vrot.slane %v41_v29, %v763_v32  ;;  %v790_v41 = vrot.slane %v41_v29, %v766_v33  ;;  %v793_v42 = vrot.slane %v41_v29, %v769_v34  ;;  %v796_v43 = vrot.slane %v41_v29, %v772_v35 }
  0x35   :  { %v799_v44 = vrot.slane %v41_v29, %v778_v37  ;;  %v802_v45 = vrot.slane %v41_v29, %v781_v38  ;;  %v805_v46 = vrot.slane %v41_v29, %v784_v39  ;;  %v808_v47 = vrot.slane %v39_v31, %v760_v30 }
  0x36   :  { %v811_v48 = vrot.slane %v39_v31, %v763_v32  ;;  %v814_v49 = vrot.slane %v39_v31, %v766_v33  ;;  %v817_v50 = vrot.slane %v39_v31, %v769_v34  ;;  %v820_v51 = vrot.slane %v39_v31, %v772_v35 }
  0x37   :  { %v823_v52 = vrot.slane %v39_v31, %v778_v37  ;;  %v826_v53 = vrot.slane %v39_v31, %v781_v38  ;;  %v829_v54 = vrot.slane %v39_v31, %v784_v39  ;;  %v272_v55 = vsel %vm92_vm0, %v775_v36, %v808_v47 }
  0x38   :  { %v273_v56 = vsel %vm93_vm1, %v787_v40, %v811_v48  ;;  %v274_v57 = vsel %vm94_vm2, %v790_v41, %v814_v49  ;;  %v275_v58 = vsel %vm95_vm3, %v793_v42, %v817_v50  ;;  %v276_v59 = vsel %vm96_vm4, %v796_v43, %v820_v51 }
  0x39   :  { %v277_v60 = vsel %vm97_vm5, %v799_v44, %v823_v52  ;;  %v278_v61 = vsel %vm98_vm6, %v802_v45, %v826_v53  ;;  %v279_v62 = vsel %vm99_vm7, %v805_v46, %v829_v54  ;;  %v304_v63 = vcombine.low %v272_v55, %v273_v56 }
  0x3a   :  { %v305_v0 = vcombine.low %v274_v57, %v275_v58  ;;  %v306_v1 = vcombine.low %v276_v59, %v277_v60  ;;  %v307_v6 = vcombine.low %v278_v61, %v279_v62  ;;  %v866_v7 = vsub.s32 %v310_v5, %v724_v4 }
  0x3b   :  { %v52_v8 = vadd.s32 1024, %v722_v3  ;;  %v53_v9 = vadd.s32 1152, %v722_v3  ;;  %v54_v10 = vadd.s32 1280, %v722_v3  ;;  %v55_v11 = vadd.s32 1408, %v722_v3 }
  0x3c   :  { %v314_v12 = vrot.slane %v304_v63, %v866_v7  ;;  %v321_v13 = vrot.slane %v305_v0, %v866_v7  ;;  %v328_v14 = vrot.slane %v306_v1, %v866_v7  ;;  %v335_v15 = vrot.slane %v307_v6, %v866_v7  ;;  %v42_v1 = vld [vmem:[#allocation5 + $0x8] sm:$0xff] }
  0x3d   :  { %v56_v2 = vadd.s32 1536, %v722_v3  ;;  %v57_v4 = vadd.s32 1664, %v722_v3  ;;  %v58_v5 = vadd.s32 1792, %v722_v3  ;;  %v59_v16 = vadd.s32 1920, %v722_v3 }
  0x3e   :  { %v336_v17 = vcombine.low %v314_v12, %v321_v13  ;;  %v337_v18 = vcombine.low %v328_v14, %v335_v15  ;;  %v68_v19 = vand.u32 15, %v52_v8  ;;  %v69_v20 = vand.u32 15, %v53_v9 }
  0x3f   :  { %v70_v29 = vand.u32 15, %v54_v10  ;;  %v71_v31 = vand.u32 15, %v55_v11  ;;  %v72_v55 = vand.u32 15, %v56_v2  ;;  %v73_v56 = vand.u32 15, %v57_v4  ;;  %v40_v11 = vld [vmem:[#allocation2 + $0x8] sm:$0xff] }
  0x40   :  { %v344_v57 = vrot.slane %v336_v17, %v866_v7  ;;  %v351_v58 = vrot.slane %v337_v18, %v866_v7  ;;  %v74_v59 = vand.u32 15, %v58_v5  ;;  %v75_v60 = vand.u32 15, %v59_v16 }
  0x41   :  { %v882_v61 = vand.u32 1, %v68_v19  ;;  %v884_v62 = vand.u32 1, %v69_v20  ;;  %v886_v63 = vand.u32 1, %v70_v29  ;;  %v888_v3 = vand.u32 1, %v71_v31 }
  0x42   :  { %v352_v0 = vcombine.low %v344_v57, %v351_v58  ;;  %v890_v6 = vand.u32 1, %v72_v55  ;;  %v892_v8 = vand.u32 1, %v73_v56  ;;  %v894_v9 = vand.u32 1, %v74_v59 }
  0x43   :  { %v896_v10 = vand.u32 1, %v75_v60  ;;  %vm100_vm8 = vcmp.eq.s32.totalorder %v882_v61, 0  ;;  %vm101_vm9 = vcmp.eq.s32.totalorder %v884_v62, 0  ;;  %vm102_vm10 = vcmp.eq.s32.totalorder %v886_v63, 0 }
  0x44   :  { %404 = vst [vmem:[#allocation7] sm:$0xff] %v352_v0  ;;  %vm103_vm11 = vcmp.eq.s32.totalorder %v888_v3, 0  ;;  %vm104_vm12 = vcmp.eq.s32.totalorder %v890_v6, 0  ;;  %vm105_vm13 = vcmp.eq.s32.totalorder %v892_v8, 0  ;;  %vm106_vm14 = vcmp.eq.s32.totalorder %v894_v9, 0 }
  0x45   :  { %vm107_vm15 = vcmp.eq.s32.totalorder %v896_v10, 0  ;;  %v145_v12 = vrot.slane %v42_v1, %v760_v30  ;;  %v149_v13 = vrot.slane %v42_v1, %v763_v32  ;;  %v153_v14 = vrot.slane %v42_v1, %v766_v33 }
  0x46   :  { %v157_v15 = vrot.slane %v42_v1, %v769_v34  ;;  %v161_v2 = vrot.slane %v42_v1, %v772_v35  ;;  %v165_v4 = vrot.slane %v42_v1, %v778_v37  ;;  %v169_v5 = vrot.slane %v42_v1, %v781_v38 }
  0x47   :  { %v173_v16 = vrot.slane %v42_v1, %v784_v39  ;;  %v227_v17 = vrot.slane %v40_v11, %v760_v30  ;;  %v231_v18 = vrot.slane %v40_v11, %v763_v32  ;;  %v235_v19 = vrot.slane %v40_v11, %v766_v33 }
  0x48   :  { %v239_v20 = vrot.slane %v40_v11, %v769_v34  ;;  %v243_v29 = vrot.slane %v40_v11, %v772_v35  ;;  %v247_v31 = vrot.slane %v40_v11, %v778_v37  ;;  %v251_v55 = vrot.slane %v40_v11, %v781_v38 }
  0x49   :  { %v255_v56 = vrot.slane %v40_v11, %v784_v39  ;;  %v280_v57 = vsel %vm100_vm8, %v145_v12, %v227_v17  ;;  %v281_v30 = vsel %vm101_vm9, %v149_v13, %v231_v18  ;;  %v282_v32 = vsel %vm102_vm10, %v153_v14, %v235_v19 }
  0x4a   :  { %v283_v33 = vsel %vm103_vm11, %v157_v15, %v239_v20  ;;  %v284_v34 = vsel %vm104_vm12, %v161_v2, %v243_v29  ;;  %v285_v35 = vsel %vm105_vm13, %v165_v4, %v247_v31  ;;  %v286_v37 = vsel %vm106_vm14, %v169_v5, %v251_v55 }
  0x4b   :  { %v287_v38 = vsel %vm107_vm15, %v173_v16, %v255_v56  ;;  %v353_v39 = vcombine.low %v280_v57, %v281_v30  ;;  %v354_v58 = vcombine.low %v282_v32, %v283_v33  ;;  %v355_v59 = vcombine.low %v284_v34, %v285_v35 }
  0x4c   :  { %v356_v60 = vcombine.low %v286_v37, %v287_v38  ;;  %v406_v0 = vsel %vm92_vm0, %v808_v47, %v775_v36  ;;  %v407_v1 = vsel %vm93_vm1, %v811_v48, %v787_v40  ;;  %v408_v11 = vsel %vm94_vm2, %v814_v49, %v790_v41 }
  0x4d   :  { %v363_v57 = vrot.slane %v353_v39, %v866_v7  ;;  %v370_v30 = vrot.slane %v354_v58, %v866_v7  ;;  %v377_v32 = vrot.slane %v355_v59, %v866_v7  ;;  %v409_v21 = vsel %vm95_vm3, %v817_v50, %v793_v42 }
  0x4e   :  { %v384_v36 = vrot.slane %v356_v60, %v866_v7  ;;  %v410_v22 = vsel %vm96_vm4, %v820_v51, %v796_v43  ;;  %v411_v23 = vsel %vm97_vm5, %v823_v52, %v799_v44  ;;  %v412_v40 = vsel %vm98_vm6, %v826_v53, %v802_v45 }
  0x4f   :  { %v385_v41 = vcombine.low %v363_v57, %v370_v30  ;;  %v413_v24 = vsel %vm99_vm7, %v829_v54, %v805_v46  ;;  %v438_v42 = vcombine.low %v406_v0, %v407_v1  ;;  %v439_v47 = vcombine.low %v408_v11, %v409_v21 }
  0x50   :  { %v386_v25 = vcombine.low %v377_v32, %v384_v36  ;;  %v440_v43 = vcombine.low %v410_v22, %v411_v23  ;;  %v441_v48 = vcombine.low %v412_v40, %v413_v24  ;;  %v414_v26 = vsel %vm100_vm8, %v227_v17, %v145_v12 }
  0x51   :  { %v393_v44 = vrot.slane %v385_v41, %v866_v7  ;;  %v448_v49 = vrot.slane %v438_v42, %v866_v7  ;;  %v455_v27 = vrot.slane %v439_v47, %v866_v7  ;;  %v415_v45 = vsel %vm101_vm9, %v231_v18, %v149_v13 }
  0x52   :  { %v400_v28 = vrot.slane %v386_v25, %v866_v7  ;;  %v462_v46 = vrot.slane %v440_v43, %v866_v7  ;;  %v469_v50 = vrot.slane %v441_v48, %v866_v7  ;;  %v416_v51 = vsel %vm102_vm10, %v235_v19, %v153_v14 }
  0x53   :  { %v470_v52 = vcombine.low %v448_v49, %v455_v27  ;;  %v417_v53 = vsel %vm103_vm11, %v239_v20, %v157_v15  ;;  %v418_v54 = vsel %vm104_vm12, %v243_v29, %v161_v2  ;;  %v419_v61 = vsel %vm105_vm13, %v247_v31, %v165_v4 }
  0x54   :  { %v401_v62 = vcombine.low %v393_v44, %v400_v28  ;;  %v471_v12 = vcombine.low %v462_v46, %v469_v50  ;;  %v420_v13 = vsel %vm106_vm14, %v251_v55, %v169_v5  ;;  %v421_v17 = vsel %vm107_vm15, %v255_v56, %v173_v16 }
  0x55   :  { %v478_v63 = vrot.slane %v470_v52, %v866_v7  ;;  %v487_v14 = vcombine.low %v414_v26, %v415_v45  ;;  %v488_v3 = vcombine.low %v416_v51, %v417_v53  ;;  %v489_v15 = vcombine.low %v418_v54, %v419_v61 }
  0x56   :  { %405 = vst [vmem:[#allocation7 + $0x8] sm:$0xff] %v401_v62  ;;  %v485_v6 = vrot.slane %v471_v12, %v866_v7  ;;  %v490_v2 = vcombine.low %v420_v13, %v421_v17 }
  0x57   :  { %v497_v8 = vrot.slane %v487_v14, %v866_v7  ;;  %v504_v4 = vrot.slane %v488_v3, %v866_v7  ;;  %v511_v9 = vrot.slane %v489_v15, %v866_v7 }
  0x58   :  { %630 = shalt.err (!%p627_p6)
}
  0x59   :  { %s631_s12 = scalar_lea.hbm %s1030_s2, 256 }
  0x5a   :  { %p632_p7 = scmp.ne.s32.totalorder %s1030_s2, %s631_s12  ;;  %p635_p8 = scmp.lt.u32.totalorder %s631_s12, %s1030_s2 }
  0x5c   :  { %p637_p9 = pnand %p635_p8, %p632_p7 }
  0x5e   :  { %640 = shalt.err (!%p637_p9)
}
  0x5f   :  { %549 = dma.vmem_to_hbm [thread:$0]  %s547_s8, 256, %s1030_s2, [#allocation4]   ;;  %v486_v10 = vcombine.low %v478_v63, %v485_v6  ;;  %v518_v5 = vrot.slane %v490_v2, %v866_v7  ;;  %v519_v16 = vcombine.low %v497_v8, %v504_v4 }
  0x60   :  { %s675_s19 = smov [#allocation8]  }
  0x61   :  { %538 = vst [vmem:[#allocation8] sm:$0xff] %v486_v10  ;;  %v520_v18 = vcombine.low %v511_v9, %v518_v5  ;;  %v527_v19 = vrot.slane %v519_v16, %v866_v7  ;;  %s556_s20 = sshll.u32 %s675_s19, 4  ;;  %s557_s20 = int_to_ptr.vmem [resolvable:$true] %s556_s20 }
  0x62   :  { %s641_s21 = scalar_lea.vmem %s557_s20, 256  ;;  %p646_p11 = scmp.lt.s32.totalorder %s557_s20, %s557_s20 }
  0x63   :  { %v534_v20 = vrot.slane %v520_v18, %v866_v7  ;;  %p642_p10 = scmp.ne.s32.totalorder %s557_s20, %s641_s21  ;;  %p647_p12 = scmp.lt.s32.totalorder %s641_s21, %s641_s21 }
  0x65   :  { %v535_v29 = vcombine.low %v527_v19, %v534_v20  ;;  %p648_p13 = por %p647_p12, %p646_p11 }
  0x67   :  { %539 = vst [vmem:[#allocation8 + $0x8] sm:$0xff] %v535_v29  ;;  %p649_p0 = pnand %p648_p13, %p642_p10 }
  0x69   :  { %652 = shalt.err (!%p649_p0)
}
  0x6a   :  { %s653_s23 = scalar_lea.hbm %s1031_s3, 256 }
  0x6b   :  { %p654_p1 = scmp.ne.s32.totalorder %s1031_s3, %s653_s23  ;;  %p657_p2 = scmp.lt.u32.totalorder %s653_s23, %s1031_s3 }
  0x6d   :  { %p659_p3 = pnand %p657_p2, %p654_p1 }
  0x6f   :  { %662 = shalt.err (!%p659_p3)
}
  0x70   :  { %559 = dma.vmem_to_hbm [thread:$0]  %s557_s20, 256, %s1031_s3, [#allocation9]  }
  0x71   :  { %667 = dma.done.wait [#allocation4], 256  }
  0x72   :  { %668 = vsyncadd [#allocation4], 4294967040 }
  0x73   :  { %669 = dma.done.wait [#allocation9], 256  }
  0x74   :  { %670 = vsyncadd [#allocation9], 4294967040 }
  0x75   :  { %566 = vsyncpa [#allocation3], 1 }
  0x76   :  { %567 = vsyncpa [#allocation6], 1 }
  0x77   :  { %568 = vsyncpa [#allocation4], 1 }
  0x78   :  { %569 = vsyncpa [#allocation9], 1 }

</bundles_post_ra>
